<compile_context>
chip_gen: v7x
topology: tpu7x:2x2x1
jax: 0.10.0
libtpu: 0.0.40
codegen_flags: <defaults>
</compile_context>

<pallas_src>
import functools

import jax
import jax.numpy as jnp
import numpy as np
from jax.experimental import pallas as pl
from jax.experimental.pallas import tpu as pltpu


def _resblock_kernel(x_ref, w1_ref, b1_ref, w2_ref, b2_ref, out_ref,
                     xpad_ref, *, K, H, W, C, bt, res_scale):
    """Fused conv(same) -> ReLU -> conv(same) -> *res_scale -> +x.

    x_ref    : (bt, H, W*C)        f32   lane-dense input block (NHWC flattened)
    w1_ref   : (K*W*C, W*C)        bf16  block-Toeplitz conv1 weights
    b1_ref   : (1, W*C)            f32   bias tiled over W
    w2_ref   : (K*W*C, W*C)        bf16
    b2_ref   : (1, W*C)            f32
    out_ref  : (bt, H, W*C)        f32
    xpad_ref : (bt, H+2P, W*C)     bf16  VMEM scratch, halo rows along H only
    """
    P = K // 2
    Hp = H + 2 * P
    WC = W * C
    M = bt * H

    # Zero only the P halo rows (full-width 256-lane stores), every grid step
    # (each core has its own scratch instance under megacore sharding).
    zrows = jnp.zeros((bt, P, WC), xpad_ref.dtype)
    xpad_ref[:, :P, :] = zrows
    xpad_ref[:, Hp - P:, :] = zrows

    def conv_same(w_ref, b_ref):
        # GEMM LHS = K row-shifted views of the padded activation, concatenated
        # along the contraction dim (no patches scratch / VMEM round-trip).
        lhs = jnp.concatenate(
            [xpad_ref[:, kh:kh + H, :] for kh in range(K)],
            axis=-1).reshape(M, K * WC)                       # (M, K*WC) bf16
        acc = jnp.dot(lhs, w_ref[...],
                      preferred_element_type=jnp.float32)     # (M, WC)  f32
        return acc + b_ref[...]

    # ---- conv1 (+bias) + ReLU --------------------------------------------
    x = x_ref[...]                                            # (bt, H, WC) f32
    xpad_ref[:, P:P + H, :] = x.astype(xpad_ref.dtype)        # full-width store
    h1 = jnp.maximum(conv_same(w1_ref, b1_ref), 0.0)          # (M, WC) f32

    # ---- conv2 (+bias): reuse halo scratch (border rows are still zero) ----
    xpad_ref[:, P:P + H, :] = h1.reshape(bt, H, WC).astype(xpad_ref.dtype)
    acc2 = conv_same(w2_ref, b2_ref)                          # (M, WC) f32

    # ---- scale + residual, lane-dense (W*C wide) store ---------------------
    out_ref[...] = (acc2.reshape(bt, H, WC) * jnp.float32(res_scale)
                    + x).astype(out_ref.dtype)


def _block_toeplitz(w, W):
    """(K, K, Cin, Cout) conv weight -> (K*W*Cin, W*Cout) block-Toeplitz matrix.

    Row index = kh*(W*Cin) + wi*Cin + cin, col index = wo*Cout + cout.
    Entry = w[kh, wi - wo + P, cin, cout] when 0 <= wi - wo + P < K, else 0,
    i.e. the 1-D conv along W with zero 'SAME' padding is baked into the matrix
    and the K row taps (kh) are stacked along the contraction dimension.
    """
    K, _, Cin, Cout = w.shape
    P = K // 2
    big = jnp.zeros((K, W, Cin, W, Cout), w.dtype)
    for kw in range(K):
        for wo in range(W):
            wi = wo + kw - P
            if 0 <= wi < W:
                big = big.at[:, wi, :, wo, :].set(w[:, kw, :, :])
    return big.reshape(K * W * Cin, W * Cout)


def _vmem_limit_bytes(default=32 * 1024 * 1024):
    """Per-generation VMEM limit: ~60% of physical, capped, with safe fallback."""
    try:
        cap = int(getattr(pltpu.get_tpu_info(), "vmem_capacity_bytes", 0))
    except Exception:
        cap = 0
    if cap <= 0:
        return default
    return min(int(cap * 0.6), 96 * 1024 * 1024)


def resblocks_forward(x_nchw, w1, b1, w2, b2, *, res_scale, bt=None):
    """x_nchw: (B, C, H, W) f32.  w*: (K, K, Cin, Cout).  b*: (C,)."""
    B, C, H, W = x_nchw.shape
    K = w1.shape[0]
    # PyTorch-style 'same' padding k//2 only matches nn.Conv2d for odd K.
    assert K % 2 == 1, "only odd kernel sizes supported (PyTorch same-pad)"
    P = K // 2
    WC = W * C

    if bt is None:
        # Fold batch into the GEMM M dim to amortize per-step overhead while
        # keeping >= 2 grid steps when possible (2 TensorCores on v7x).
        bt = 1
        for cand in range(max(B // 2, 1), 0, -1):
            if B % cand == 0:
                bt = cand
                break
    assert B % bt == 0

    # Glue: NCHW -> lane-dense (B, H, W*C); conv weights -> block-Toeplitz bf16;
    # biases tiled over W so the bias add is lane-dense.
    x = jnp.transpose(x_nchw, (0, 2, 3, 1)).reshape(B, H, WC)
    w1_t = _block_toeplitz(w1, W).astype(jnp.bfloat16)        # (K*WC, WC)
    w2_t = _block_toeplitz(w2, W).astype(jnp.bfloat16)
    b1_t = jnp.tile(b1, W).reshape(1, WC).astype(jnp.float32)
    b2_t = jnp.tile(b2, W).reshape(1, WC).astype(jnp.float32)

    kernel = functools.partial(_resblock_kernel, K=K, H=H, W=W, C=C, bt=bt,
                               res_scale=res_scale)

    out = pl.pallas_call(
        kernel,
        out_shape=jax.ShapeDtypeStruct((B, H, WC), x_nchw.dtype),
        grid=(B // bt,),
        in_specs=[
            pl.BlockSpec((bt, H, WC), lambda b: (b, 0, 0)),
            pl.BlockSpec((K * WC, WC), lambda b: (0, 0)),
            pl.BlockSpec((1, WC), lambda b: (0, 0)),
            pl.BlockSpec((K * WC, WC), lambda b: (0, 0)),
            pl.BlockSpec((1, WC), lambda b: (0, 0)),
        ],
        out_specs=pl.BlockSpec((bt, H, WC), lambda b: (b, 0, 0)),
        scratch_shapes=[
            pltpu.VMEM((bt, H + 2 * P, WC), jnp.bfloat16),    # H-halo scratch
        ],
        compiler_params=pltpu.CompilerParams(
            dimension_semantics=("parallel",),
            vmem_limit_bytes=_vmem_limit_bytes()),
    )(x, w1_t, b1_t, w2_t, b2_t)

    return jnp.transpose(out.reshape(B, H, W, C), (0, 3, 1, 2))  # back to NCHW


def _reference(x_nchw, w1, b1, w2, b2, res_scale):
    """Pure-JAX f32 reference (NCHW conv, same padding)."""
    def conv(x, w, b):
        w_oihw = jnp.transpose(w, (3, 2, 0, 1))
        y = jax.lax.conv_general_dilated(
            x, w_oihw, window_strides=(1, 1), padding="SAME",
            dimension_numbers=("NCHW", "OIHW", "NCHW"))
        return y + b.reshape(1, -1, 1, 1)

    h = jax.nn.relu(conv(x_nchw, w1, b1))
    return conv(h, w2, b2) * res_scale + x_nchw


if __name__ == "__main__":
    B, C, H, W = 2, 16, 16, 16
    K = 3
    RES_SCALE = 0.1

    key = jax.random.PRNGKey(0)
    kx, k1, kb1, k2, kb2 = jax.random.split(key, 5)

    x = jax.random.normal(kx, (B, C, H, W), dtype=jnp.float32)

    fan_in = C * K * K
    bound = 1.0 / np.sqrt(fan_in)
    w1 = jax.random.uniform(k1, (K, K, C, C), jnp.float32, -bound, bound)
    b1 = jax.random.uniform(kb1, (C,), jnp.float32, -bound, bound)
    w2 = jax.random.uniform(k2, (K, K, C, C), jnp.float32, -bound, bound)
    b2 = jax.random.uniform(kb2, (C,), jnp.float32, -bound, bound)

    out = resblocks_forward(x, w1, b1, w2, b2, res_scale=RES_SCALE)
    out = jax.block_until_ready(out)

    ref = jax.block_until_ready(_reference(x, w1, b1, w2, b2, RES_SCALE))
    # bf16 matmul operands -> loosened tolerance vs f32 reference.
    np.testing.assert_allclose(np.asarray(out), np.asarray(ref),
                               rtol=3e-2, atol=3e-2)

    print("KERNEL_OK")
</pallas_src>

<mosaic_0001>
module attributes {stable_mosaic.version = 11 : i64} {
  func.func @_resblock_kernel(%arg0: i32, %arg1: memref<1x16x256xf32, #tpu.memory_space<vmem>>, %arg2: memref<768x256xbf16, #tpu.memory_space<vmem>>, %arg3: memref<1x256xf32, #tpu.memory_space<vmem>>, %arg4: memref<768x256xbf16, #tpu.memory_space<vmem>>, %arg5: memref<1x256xf32, #tpu.memory_space<vmem>>, %arg6: memref<1x16x256xf32, #tpu.memory_space<vmem>>, %arg7: memref<1x18x256xbf16, #tpu.memory_space<vmem>>) attributes {dimension_semantics = [#tpu.dimension_semantics<parallel>], iteration_bounds = array<i64: 2>, scalar_prefetch = 0 : i64, scratch_operands = 1 : i64, tpu.core_type = #tpu.core_type<tc>, window_params = [{transform_indices = @transform_0, window_bounds = array<i64: 1, 16, 256>}, {pipeline_mode = #tpu.pipeline_mode<synchronous>, transform_indices = @transform_1, window_bounds = array<i64: 768, 256>}, {pipeline_mode = #tpu.pipeline_mode<synchronous>, transform_indices = @transform_2, window_bounds = array<i64: 1, 256>}, {pipeline_mode = #tpu.pipeline_mode<synchronous>, transform_indices = @transform_3, window_bounds = array<i64: 768, 256>}, {pipeline_mode = #tpu.pipeline_mode<synchronous>, transform_indices = @transform_4, window_bounds = array<i64: 1, 256>}, {transform_indices = @transform_5, window_bounds = array<i64: 1, 16, 256>}]} {
    %cst = arith.constant 0.000000e+00 : bf16
    %0 = vector.broadcast %cst : bf16 to vector<1x1x256xbf16>
    %c0 = arith.constant 0 : index
    %c0_0 = arith.constant 0 : index
    %c0_1 = arith.constant 0 : index
    %1 = vector.load %arg7[%c0, %c0_0, %c0_1] : memref<1x18x256xbf16, #tpu.memory_space<vmem>>, vector<1x1x256xbf16>
    tpu.vector_store %arg7[%c0, %c0_0, %c0_1], %0 {strides = array<i32>} : memref<1x18x256xbf16, #tpu.memory_space<vmem>>, vector<1x1x256xbf16>,
    %c0_2 = arith.constant 0 : index
    %c17 = arith.constant 17 : index
    %c0_3 = arith.constant 0 : index
    %2 = vector.load %arg7[%c0_2, %c17, %c0_3] : memref<1x18x256xbf16, #tpu.memory_space<vmem>>, vector<1x1x256xbf16>
    tpu.vector_store %arg7[%c0_2, %c17, %c0_3], %0 {strides = array<i32>} : memref<1x18x256xbf16, #tpu.memory_space<vmem>>, vector<1x1x256xbf16>,
    %c0_4 = arith.constant 0 : index
    %c0_5 = arith.constant 0 : index
    %c0_6 = arith.constant 0 : index
    %3 = vector.load %arg1[%c0_4, %c0_5, %c0_6] : memref<1x16x256xf32, #tpu.memory_space<vmem>>, vector<1x16x256xf32>
    %4 = arith.truncf %3 : vector<1x16x256xf32> to vector<1x16x256xbf16>
    %c0_7 = arith.constant 0 : index
    %c1 = arith.constant 1 : index
    %c0_8 = arith.constant 0 : index
    %5 = vector.load %arg7[%c0_7, %c1, %c0_8] : memref<1x18x256xbf16, #tpu.memory_space<vmem>>, vector<1x16x256xbf16>
    tpu.vector_store %arg7[%c0_7, %c1, %c0_8], %4 {strides = array<i32>} : memref<1x18x256xbf16, #tpu.memory_space<vmem>>, vector<1x16x256xbf16>,
    %c0_9 = arith.constant 0 : index
    %c0_10 = arith.constant 0 : index
    %c0_11 = arith.constant 0 : index
    %6 = vector.load %arg7[%c0_9, %c0_10, %c0_11] : memref<1x18x256xbf16, #tpu.memory_space<vmem>>, vector<1x16x256xbf16>
    %c0_12 = arith.constant 0 : index
    %c1_13 = arith.constant 1 : index
    %c0_14 = arith.constant 0 : index
    %7 = vector.load %arg7[%c0_12, %c1_13, %c0_14] : memref<1x18x256xbf16, #tpu.memory_space<vmem>>, vector<1x16x256xbf16>
    %c0_15 = arith.constant 0 : index
    %c2 = arith.constant 2 : index
    %c0_16 = arith.constant 0 : index
    %8 = vector.load %arg7[%c0_15, %c2, %c0_16] : memref<1x18x256xbf16, #tpu.memory_space<vmem>>, vector<1x16x256xbf16>
    %9 = tpu.concatenate %6, %7, %8 in 2 : vector<1x16x256xbf16>, vector<1x16x256xbf16>, vector<1x16x256xbf16> -> vector<1x16x768xbf16>
    %10 = vector.shape_cast %9 : vector<1x16x768xbf16> to vector<16x768xbf16>
    %c0_17 = arith.constant 0 : index
    %c0_18 = arith.constant 0 : index
    %11 = vector.load %arg2[%c0_17, %c0_18] : memref<768x256xbf16, #tpu.memory_space<vmem>>, vector<768x256xbf16>
    %cst_19 = arith.constant dense<0.000000e+00> : vector<16x256xf32>
    %12 = tpu.matmul %10, %11, %cst_19 {dimension_numbers = #tpu.dot_dimension_numbers<[1], [0], [0], [1], [0, 0, 1, 1], [], []>} : vector<16x768xbf16>, vector<768x256xbf16>, vector<16x256xf32> -> vector<16x256xf32>
    %c0_20 = arith.constant 0 : index
    %c0_21 = arith.constant 0 : index
    %13 = vector.load %arg3[%c0_20, %c0_21] : memref<1x256xf32, #tpu.memory_space<vmem>>, vector<1x256xf32>
    %14 = vector.broadcast %13 : vector<1x256xf32> to vector<16x256xf32>
    %15 = arith.addf %12, %14 : vector<16x256xf32>
    %cst_22 = arith.constant 0.000000e+00 : f32
    %16 = vector.broadcast %cst_22 : f32 to vector<16x256xf32>
    %17 = arith.maximumf %15, %16 : vector<16x256xf32>
    %18 = vector.shape_cast %17 : vector<16x256xf32> to vector<1x16x256xf32>
    %19 = arith.truncf %18 : vector<1x16x256xf32> to vector<1x16x256xbf16>
    %c0_23 = arith.constant 0 : index
    %c1_24 = arith.constant 1 : index
    %c0_25 = arith.constant 0 : index
    %20 = vector.load %arg7[%c0_23, %c1_24, %c0_25] : memref<1x18x256xbf16, #tpu.memory_space<vmem>>, vector<1x16x256xbf16>
    tpu.vector_store %arg7[%c0_23, %c1_24, %c0_25], %19 {strides = array<i32>} : memref<1x18x256xbf16, #tpu.memory_space<vmem>>, vector<1x16x256xbf16>,
    %c0_26 = arith.constant 0 : index
    %c0_27 = arith.constant 0 : index
    %c0_28 = arith.constant 0 : index
    %21 = vector.load %arg7[%c0_26, %c0_27, %c0_28] : memref<1x18x256xbf16, #tpu.memory_space<vmem>>, vector<1x16x256xbf16>
    %c0_29 = arith.constant 0 : index
    %c1_30 = arith.constant 1 : index
    %c0_31 = arith.constant 0 : index
    %22 = vector.load %arg7[%c0_29, %c1_30, %c0_31] : memref<1x18x256xbf16, #tpu.memory_space<vmem>>, vector<1x16x256xbf16>
    %c0_32 = arith.constant 0 : index
    %c2_33 = arith.constant 2 : index
    %c0_34 = arith.constant 0 : index
    %23 = vector.load %arg7[%c0_32, %c2_33, %c0_34] : memref<1x18x256xbf16, #tpu.memory_space<vmem>>, vector<1x16x256xbf16>
    %24 = tpu.concatenate %21, %22, %23 in 2 : vector<1x16x256xbf16>, vector<1x16x256xbf16>, vector<1x16x256xbf16> -> vector<1x16x768xbf16>
    %25 = vector.shape_cast %24 : vector<1x16x768xbf16> to vector<16x768xbf16>
    %c0_35 = arith.constant 0 : index
    %c0_36 = arith.constant 0 : index
    %26 = vector.load %arg4[%c0_35, %c0_36] : memref<768x256xbf16, #tpu.memory_space<vmem>>, vector<768x256xbf16>
    %cst_37 = arith.constant dense<0.000000e+00> : vector<16x256xf32>
    %27 = tpu.matmul %25, %26, %cst_37 {dimension_numbers = #tpu.dot_dimension_numbers<[1], [0], [0], [1], [0, 0, 1, 1], [], []>} : vector<16x768xbf16>, vector<768x256xbf16>, vector<16x256xf32> -> vector<16x256xf32>
    %c0_38 = arith.constant 0 : index
    %c0_39 = arith.constant 0 : index
    %28 = vector.load %arg5[%c0_38, %c0_39] : memref<1x256xf32, #tpu.memory_space<vmem>>, vector<1x256xf32>
    %29 = vector.broadcast %28 : vector<1x256xf32> to vector<16x256xf32>
    %30 = arith.addf %27, %29 : vector<16x256xf32>
    %31 = vector.shape_cast %30 : vector<16x256xf32> to vector<1x16x256xf32>
    %cst_40 = arith.constant 1.000000e-01 : f32
    %32 = vector.broadcast %cst_40 : f32 to vector<1x16x256xf32>
    %33 = arith.mulf %31, %32 : vector<1x16x256xf32>
    %34 = arith.addf %33, %3 : vector<1x16x256xf32>
    %c0_41 = arith.constant 0 : index
    %c0_42 = arith.constant 0 : index
    %c0_43 = arith.constant 0 : index
    %35 = vector.load %arg6[%c0_41, %c0_42, %c0_43] : memref<1x16x256xf32, #tpu.memory_space<vmem>>, vector<1x16x256xf32>
    tpu.vector_store %arg6[%c0_41, %c0_42, %c0_43], %34 {strides = array<i32>} : memref<1x16x256xf32, #tpu.memory_space<vmem>>, vector<1x16x256xf32>,
    return
  }
  func.func @transform_0(%arg0: i32) -> (i32, i32, i32) {
    %c0_i32 = arith.constant 0 : i32
    %c0_i32_0 = arith.constant 0 : i32
    %c0_i32_1 = arith.constant 0 : i32
    return %arg0, %c0_i32, %c0_i32_0 : i32, i32, i32
  }
  func.func @transform_1(%arg0: i32) -> (i32, i32) {
    %c0_i32 = arith.constant 0 : i32
    %c0_i32_0 = arith.constant 0 : i32
    %c0_i32_1 = arith.constant 0 : i32
    return %c0_i32, %c0_i32_0 : i32, i32
  }
  func.func @transform_2(%arg0: i32) -> (i32, i32) {
    %c0_i32 = arith.constant 0 : i32
    %c0_i32_0 = arith.constant 0 : i32
    %c0_i32_1 = arith.constant 0 : i32
    return %c0_i32, %c0_i32_0 : i32, i32
  }
  func.func @transform_3(%arg0: i32) -> (i32, i32) {
    %c0_i32 = arith.constant 0 : i32
    %c0_i32_0 = arith.constant 0 : i32
    %c0_i32_1 = arith.constant 0 : i32
    return %c0_i32, %c0_i32_0 : i32, i32
  }
  func.func @transform_4(%arg0: i32) -> (i32, i32) {
    %c0_i32 = arith.constant 0 : i32
    %c0_i32_0 = arith.constant 0 : i32
    %c0_i32_1 = arith.constant 0 : i32
    return %c0_i32, %c0_i32_0 : i32, i32
  }
  func.func @transform_5(%arg0: i32) -> (i32, i32, i32) {
    %c0_i32 = arith.constant 0 : i32
    %c0_i32_0 = arith.constant 0 : i32
    %c0_i32_1 = arith.constant 0 : i32
    return %arg0, %c0_i32, %c0_i32_0 : i32, i32, i32
  }
}

</mosaic_0001>

<bundles_post_ra>
// kernel: tpu_custom_call.1
= control target key start
LH: loop header
LB: loop body
LE: loop exit
PB: predicated region body
PF: predicated region fallthrough
CT: control target
= control target key end

     0   :  { %10 = vsyncpa [#allocation4], 0  ;;  %s3254_s0 = inlined_call_operand.hbm [shape: f32[2,16,256], index: 0, kind: input, shape index: {}]   ;;  %s3255_s1 = inlined_call_operand.hbm [shape: bf16[768,256], index: 1, kind: input, shape index: {}]   ;;  %s3256_s2 = inlined_call_operand.vmem [shape: f32[1,256], index: 2, kind: input, shape index: {}]   ;;  %s3257_s3 = inlined_call_operand.hbm [shape: bf16[768,256], index: 3, kind: input, shape index: {}]   ;;  %s3258_s4 = inlined_call_operand.vmem [shape: f32[1,256], index: 4, kind: input, shape index: {}]   ;;  %s3259_s5 = inlined_call_operand.hbm [shape: f32[2,16,256], index: 5, kind: output, shape index: {}]  }
   0x1   :  { %12 = vsyncpa [#allocation4 + $0x1], 0 }
   0x2   :  { %13 = vsyncpa [#allocation7], 0 }
   0x3   :  { %14 = vsyncpa [#allocation5], 0 }
   0x4   :  { %16 = vsyncpa [#allocation5 + $0x1], 0  ;;  %s2872_s18 = smov 0   ;;  %s2874_s19 = smov 0  }
   0x5   :  { %s2876_s20 = smov 0   ;;  %s2878_s21 = smov 0  }
   0x6 LB: > { %s2893_s22 = sadd.s32 4294967295, %s2830_s21   ;;  %s2049_s23 = sadd.s32 4294967294, %s2830_s21   ;;  %s2830_s21 = sphi %s2878_s21, %s3287_s21   ;;  %s2826_s20 = sphi %s2876_s20, %s3286_s20   ;;  %s2822_s19 = sphi %s2874_s19, %s3285_s19   ;;  %s2818_s18 = sphi %s2872_s18, %s3284_s18  }
   0x7   : > { %p42_p0 = scmp.ne.s32.totalorder %s2822_s19, %s2818_s18  ;;  %p3260_p1 = scmp.eq.s32.totalorder %s2893_s22, 0 }
   0x8   : > { %p156_p3 = scmp.eq.s32.totalorder %s2049_s23, 1  ;;  %p2050_p5 = scmp.ge.s32.totalorder %s2830_s21, 1 }
   0x9   : > { %p2902_p4 = por %p3260_p1, %p42_p0  ;;  %p163_p7 = scmp.lt.s32.totalorder %s2830_s21, 3 }
   0xa   : > { %p2907_p6 = por %p156_p3, %p42_p0  ;;  %s2832_s27 = smov [#allocation6]  }
   0xb   : > { %s3263_s24 = scalar_select %p2902_p4, 1, 0 }
   0xc   : > { %s3264_s25 = scalar_select %p2907_p6, 1, 0 }
   0xd   : > { %p2912_p8 = pnand %p2050_p5, %p163_p7  ;;  %s175_s28 = sshll.u32 %s2832_s27, 4  ;;  %s2916_s28 = int_to_ptr.vmem [resolvable:$true] %s175_s28 }
   0xe   : > { %s2833_s30 = smov [#allocation8]   ;;  %s2674_s9 = scalar_lea.hbm %s3255_s1, 12288 }
   0xf   : > { %p2317_p9 = pneg %p2912_p8  ;;  %s191_s6 = sshll.u32 %s2833_s30, 4  ;;  %s2927_s6 = int_to_ptr.vmem [resolvable:$true] %s191_s6 }
  0x10   : > { %p2675_p12 = scmp.ne.s32.totalorder %s3255_s1, %s2674_s9  ;;  %p2681_p5 = scmp.lt.u32.totalorder %s2674_s9, %s3255_s1 }
  0x11   : > { %p2923_p11 = pnand %p2317_p9, %p3260_p1 }
  0x13   : > { %p2676_p13 = pneg %p2923_p11 }
  0x15   : > { %p2677_p0 = pnand %p2676_p13, %p2675_p12 }
  0x17   : > { %p2678_p3 = pneg %p2677_p0 }
  0x19   : > { %p2683_p7 = pnand %p2681_p5, %p2678_p3 }
  0x1b   : > { %2686 = shalt.err (!%p2683_p7)
}
  0x1c   : > { %s2687_s14 = scalar_lea.vmem %s2916_s28, 12288  ;;  %p2695_p2 = scmp.lt.s32.totalorder %s2916_s28, %s2916_s28 }
  0x1d   : > { %p2688_p9 = scmp.ne.s32.totalorder %s2916_s28, %s2687_s14  ;;  %p2696_p12 = scmp.lt.s32.totalorder %s2687_s14, %s2687_s14 }
  0x1f   : > { %p2690_p10 = pnand %p2688_p9, %p2676_p13  ;;  %p2697_p0 = por %p2696_p12, %p2695_p2 }
  0x21   : > { %p2691_p1 = pneg %p2690_p10 }
  0x23   : > { %p2698_p6 = pnand %p2697_p0, %p2691_p1 }
  0x25   : > { %2701 = shalt.err (!%p2698_p6)
}
  0x26   : > { %s2834_s15 = smov 128   ;;  %s2835_s16 = smov 8  }
  0x27   : > { %2320 = dma.hbm_to_vmem [thread:$0]  (!%p2923_p11), %s3255_s1, 12288, %s2916_s28, [#allocation7], %s2834_s15, %s2834_s15, %s2835_s16  }
  0x28   : > { %s2702_s7 = scalar_lea.hbm %s3257_s3, 12288 }
  0x29   : > { %p2703_p2 = scmp.ne.s32.totalorder %s3257_s3, %s2702_s7  ;;  %p2709_p10 = scmp.lt.u32.totalorder %s2702_s7, %s3257_s3 }
  0x2b   : > { %p2705_p1 = pnand %p2703_p2, %p2676_p13 }
  0x2d   : > { %p2706_p6 = pneg %p2705_p1 }
  0x2f   : > { %p2711_p3 = pnand %p2709_p10, %p2706_p6 }
  0x31   : > { %2714 = shalt.err (!%p2711_p3)
}
  0x32   : > { %s2715_s28 = scalar_lea.vmem %s2927_s6, 12288  ;;  %p2723_p12 = scmp.lt.s32.totalorder %s2927_s6, %s2927_s6 }
  0x33   : > { %p2716_p5 = scmp.ne.s32.totalorder %s2927_s6, %s2715_s28  ;;  %p2724_p0 = scmp.lt.s32.totalorder %s2715_s28, %s2715_s28 }
  0x35   : > { %p2718_p7 = pnand %p2716_p5, %p2676_p13  ;;  %p2725_p2 = por %p2724_p0, %p2723_p12 }
  0x37   : > { %p2719_p9 = pneg %p2718_p7 }
  0x39   : > { %p2726_p1 = pnand %p2725_p2, %p2719_p9 }
  0x3b   : > { %2729 = shalt.err (!%p2726_p1)
}
  0x3c   : > { %2323 = dma.hbm_to_vmem [thread:$0]  (!%p2923_p11), %s3257_s3, 12288, %s2927_s6, [#allocation7], %s2834_s15, %s2834_s15, %s2835_s16  }
  0x3d   : > { %s2982_s14 = sadd.s32 1, %s2830_s21   ;;  %s29_s29 = sadd.s32 1, %s2826_s20 }
  0x3e   : > { %s26_s17 = ssub.s32 %s2830_s21, %s2982_s14  ;;  %p36_p13 = scmp.ne.s32.totalorder %s2826_s20, %s2822_s19 }
  0x3f   : > { %p27_p6 = scmp.eq.s32.totalorder %s26_s17, 0  ;;  %p37_p10 = scmp.eq.s32.totalorder %s2830_s21, 0 }
  0x40   : > { %p3267_p3 = scmp.eq.s32.totalorder %s2893_s22, 1  ;;  %p2334_p7 = scmp.lt.s32.totalorder %s2830_s21, 2 }
  0x41   : > { %s2998_s27 = scalar_select %p27_p6, %s2826_s20, %s29_s29  }
  0x42   : > { %p2992_p5 = por %p3267_p3, %p36_p13  ;;  %p38_p9 = por %p37_p10, %p36_p13 }
  0x43   : > { %s208_s30 = sand.u32 1, %s2826_s20   ;;  %s2275_s6 = sshll.u32 %s2830_s21, 9 }
  0x44   : > { %s3268_s23 = scalar_select %p2992_p5, 1, 0 }
  0x45   : > { %s2054_s7 = sshll.u32 %s208_s30, 5  ;;  %s3005_s8 = scalar_lea.hbm %s3254_s0, %s2275_s6 }
  0x46   : > { %s212_s9 = scalar_lea.vmem [#allocation3], %s2054_s7  ;;  %p3009_p11 = pnand %p2334_p7, %p38_p9 }
  0x47   : > { %s219_s10 = sshll.u32 %s212_s9, 4  ;;  %s3013_s28 = scalar_lea.sflag [#allocation4], %s208_s30  ;;  %s3007_s10 = int_to_ptr.vmem [resolvable:$true] %s219_s10 }
  0x48   : > { %s2730_s12 = scalar_lea.hbm %s3005_s8, 512  ;;  %p2732_p0 = pneg %p3009_p11 }
  0x49   : > { %p2731_p12 = scmp.ne.s32.totalorder %s3005_s8, %s2730_s12  ;;  %s2735_s17 = scalar_lea.hbm %s3254_s0, 1024 }
  0x4a   : > { %p2736_p13 = scmp.lt.u32.totalorder %s3005_s8, %s3254_s0  ;;  %p2737_p6 = scmp.lt.u32.totalorder %s2735_s17, %s2730_s12 }
  0x4b   : > { %p2733_p2 = pnand %p2732_p0, %p2731_p12  ;;  %p2739_p3 = scmp.lt.u32.totalorder %s2730_s12, %s3005_s8 }
  0x4c   : > { %p2738_p10 = por %p2737_p6, %p2736_p13 }
  0x4d   : > { %p2734_p1 = pneg %p2733_p2 }
  0x4e   : > { %p2740_p7 = por %p2739_p3, %p2738_p10 }
  0x50   : > { %p2741_p9 = pnand %p2740_p7, %p2734_p1 }
  0x52   : > { %2744 = shalt.err (!%p2741_p9)
}
  0x53   : > { %s2745_s30 = scalar_lea.vmem %s3007_s10, 512  ;;  %s2836_s15 = smov [#allocation3]  }
  0x54   : > { %p2746_p12 = scmp.ne.s32.totalorder %s3007_s10, %s2745_s30  ;;  %s2750_s16 = sshll.u32 %s2836_s15, 4  ;;  %s2751_s16 = int_to_ptr.vmem [resolvable:$false] %s2750_s16 }
  0x55   : > { %s2752_s9 = scalar_lea.vmem %s2751_s16, 1024  ;;  %p2753_p4 = scmp.lt.s32.totalorder %s3007_s10, %s2751_s16 }
  0x56   : > { %p2748_p2 = pnand %p2746_p12, %p2732_p0  ;;  %p2754_p13 = scmp.lt.s32.totalorder %s2752_s9, %s2745_s30 }
  0x58   : > { %p2749_p5 = pneg %p2748_p2  ;;  %p2755_p6 = por %p2754_p13, %p2753_p4 }
  0x5a   : > { %p2756_p10 = pnand %p2755_p6, %p2749_p5 }
  0x5c   : > { %2759 = shalt.err (!%p2756_p10)
}
  0x5d   : > { %s2837_s12 = smov 256   ;;  %s2838_s13 = smov 16  }
  0x5e   : > { %2327 = dma.hbm_to_vmem [thread:$0]  (!%p3009_p11), %s3005_s8, 512, %s3007_s10, %s3013_s28, %s2837_s12, %s2837_s12, %s2838_s13  }
  0x5f   : > { %231 = sbr.rel (%p2912_p8) target bundleno = 894 (0x37e), region = 40  ;;  %s3044_s29 = sand.u32 (!%p2912_p8), 1, %s2822_s19  }
  0x60   : > { %s2058_s17 = sshll.u32 (!%p2912_p8), %s3044_s29, 5  ;;  %s234_s7 = scalar_lea.sflag (!%p2912_p8), [#allocation4], %s3044_s29 }
  0x61   : > { %s3050_s6 = scalar_lea.vmem (!%p2912_p8), [#allocation3], %s2058_s17  ;;  %p3270_p4 = scmp.ne.s32.totalorder (!%p2912_p8), %s3263_s24, 0 }
  0x66   : > { %2805 = dma.done.wait (%p3270_p4), %s234_s7, 512  }
  0x67   : > { %2807 = vsyncadd (%p3270_p4), %s234_s7, 4294966784  ;;  %p3271_p5 = scmp.eq.s32.totalorder %s2893_s22, 0 }
  0x69   : > { %2809 = dma.done.wait (%p3271_p5), [#allocation7], 24576   ;;  %p3272_p8 = pmov %p3271_p5 }
  0x6a   : > { %v2378_v0 = vld [vmem:[#allocation6 + $0x4] ss:$8 sps:$4 sm:$0xff]   ;;  %v2380_v1 = vld [vmem:[#allocation6] ss:$8 sps:$4 sm:$0xff]   ;;  %v2381_v2 = vld [vmem:[#allocation6 + $0x14] ss:$8 sps:$4 sm:$0xff]  }
  0x6b   : > { %2811 = vsyncadd (%p3272_p8), [#allocation7], 4294942720  ;;  %987 = vmatprep.subr.bf16.mxu0 %v2378_v0  ;;  %v2383_v3 = vld [vmem:[#allocation6 + $0x10] ss:$8 sps:$4 sm:$0xff]   ;;  %v2384_v4 = vld [vmem:[#allocation6 + $0x24] ss:$8 sps:$4 sm:$0xff]  }
  0x6c   : > { %988 = vmatpush1.bf16.msra.mxu0 %v2380_v1  ;;  %v2386_v5 = vld [vmem:[#allocation6 + $0x20] ss:$8 sps:$4 sm:$0xff]   ;;  %v2387_v6 = vld [vmem:[#allocation6 + $0x34] ss:$8 sps:$4 sm:$0xff]   ;;  %vm273_vm0 = vcmask 1040384   ;;  %vm276_vm2 = vcmask 1044484  }
  0x6d   : > { %989 = vmatprep.subr.bf16.mxu0 %v2381_v2  ;;  %v2389_v7 = vld [vmem:[#allocation6 + $0x30] ss:$8 sps:$4 sm:$0xff]   ;;  %vm274_vm1 = vsmask.f32 256  ;;  %v2390_v8 = vld [vmem:[#allocation6 + $0x44] ss:$8 sps:$4 sm:$0xff]  }
  0x6e   : > { %vm277_vm3 = vsmask.f32 4352  ;;  %vm275_vm4 = vmand %vm273_vm0, %vm274_vm1  ;;  %v2392_v9 = vld [vmem:[#allocation6 + $0x40] ss:$8 sps:$4 sm:$0xff]   ;;  %v2393_v10 = vld [vmem:[#allocation6 + $0x54] ss:$8 sps:$4 sm:$0xff]  }
  0x6f   : > { %vm278_vm5 = vmand %vm276_vm2, %vm277_vm3  ;;  %v2395_v11 = vld [vmem:[#allocation6 + $0x50] ss:$8 sps:$4 sm:$0xff]   ;;  %v2396_v13 = vld [vmem:[#allocation6 + $0x64] ss:$8 sps:$4 sm:$0xff]   ;;  %vm283_vm7 = vsmask.f32 7938 }
  0x70   : > { %990 = vmatpush1.bf16.msra.mxu0 %v2383_v3  ;;  %vm3063_vm6 = vmor %vm278_vm5, %vm275_vm4  ;;  %v280_v14 = vld [vmem:[#allocation2] sm:$0x11]  ;;  %vm285_vm8 = vsmask.f32 7954  ;;  %v291_v15 = vld [vmem:[%s3050_s6] sm:$0xff]  ;;  %vm327_vm9 = vcmask 1043456  }
  0x71   : > { %991 = vmatprep.subr.bf16.mxu0 %v2384_v4  ;;  %v281_v16 = vsel %vm3063_vm6, 0, %v280_v14  ;;  %v292_v17 = vld [vmem:[%s3050_s6 + $0x8] sm:$0xff]  ;;  %v293_v18 = vld [vmem:[%s3050_s6 + $0x10] sm:$0xff]  ;;  %v294_v19 = vld [vmem:[%s3050_s6 + $0x18] sm:$0xff]  ;;  %vm329_vm10 = vcmask 1047556   ;;  %s271_s11 = scalar_lea.vmem [#allocation9], %s2058_s17 }
  0x72   : > { %v2398_v20 = vld [vmem:[#allocation6 + $0x60] ss:$8 sps:$4 sm:$0xff]   ;;  %282 = vst [vmem:[#allocation2] sm:$0x11] %v281_v16  ;;  %v2276_v21 = vpack.c.bf16 %v292_v17, %v291_v15  ;;  %v2277_v22 = vpack.c.bf16 %v294_v19, %v293_v18  ;;  %v2399_v23 = vld [vmem:[#allocation6 + $0x74] ss:$8 sps:$4 sm:$0xff]   ;;  %vm3074_vm12 = vmand %vm327_vm9, %vm283_vm7 }
  0x73   : > { %vm305_vm11 = vsmask.f32 4368  ;;  %vm3079_vm13 = vmand %vm329_vm10, %vm285_vm8  ;;  %v2401_v30 = vld [vmem:[#allocation6 + $0x70] ss:$8 sps:$4 sm:$0xff]   ;;  %v2402_v31 = vld [vmem:[#allocation6 + $0x84] ss:$8 sps:$4 sm:$0xff]  }
  0x74   : > { %992 = vmatpush1.bf16.msra.mxu0 %v2386_v5  ;;  %v308_v25 = vshrl.u32 %v2276_v21, 16  ;;  %v311_v26 = vshll.u32 %v2276_v21, 16  ;;  %v316_v27 = vshrl.u32 %v2277_v22, 16  ;;  %v319_v28 = vshll.u32 %v2277_v22, 16  ;;  %vm3084_vm14 = vmor %vm274_vm1, %vm305_vm11  ;;  %v2404_v39 = vld [vmem:[#allocation6 + $0x80] ss:$8 sps:$4 sm:$0xff]  }
  0x75   : > { %993 = vmatprep.subr.bf16.mxu0 %v2387_v6  ;;  %vm331_vm15 = vmor %vm3079_vm13, %vm3074_vm12  ;;  %v2405_v42 = vld [vmem:[#allocation6 + $0x94] ss:$8 sps:$4 sm:$0xff]   ;;  %v2407_v44 = vld [vmem:[#allocation6 + $0x90] ss:$8 sps:$4 sm:$0xff]   ;;  %s1957_s28 = sshll.u32 %s271_s11, 4  ;;  %s2280_s30 = sshll.u32 %s2893_s22, 9  ;;  %s3202_s28 = int_to_ptr.vmem [resolvable:$true] %s1957_s28 }
  0x76   : > { %v310_v33 = vrot.slane %v308_v25, 7  ;;  %v318_v34 = vrot.slane %v316_v27, 7  ;;  %v2408_v45 = vld [vmem:[#allocation6 + $0xa4] ss:$8 sps:$4 sm:$0xff]   ;;  %vm284_vm1 = vmand %vm273_vm0, %vm283_vm7  ;;  %v2410_v46 = vld [vmem:[#allocation6 + $0xa0] ss:$8 sps:$4 sm:$0xff]   ;;  %s3209_s22 = scalar_lea.hbm %s3259_s5, %s2280_s30 }
  0x77   : > { %vm286_vm3 = vmand %vm276_vm2, %vm285_vm8  ;;  %v2411_v47 = vld [vmem:[#allocation6 + $0xb4] ss:$8 sps:$4 sm:$0xff]   ;;  %v2413_v48 = vld [vmem:[#allocation6 + $0xb0] ss:$8 sps:$4 sm:$0xff]   ;;  %vm358_vm0 = vsmask.f32 7424 }
  0x78   : > { %994 = vmatpush1.bf16.msra.mxu0 %v2389_v7  ;;  %v313_v35 = vor.u32 %v311_v26, %v310_v33  ;;  %v314_v36 = vrot.slane %v310_v33, 4  ;;  %v321_v37 = vor.u32 %v319_v28, %v318_v34  ;;  %vm287_vm4 = vmor %vm286_vm3, %vm284_vm1  ;;  %v2414_v49 = vld [vmem:[#allocation6 + $0xc4] ss:$8 sps:$4 sm:$0xff]   ;;  %v288_v50 = vld [vmem:[#allocation2 + $0x10] sm:$0x11]  ;;  %v323_v56 = vrot.slane %v318_v34, 4 }
  0x79   : > { %995 = vmatprep.subr.bf16.mxu0 %v2390_v8  ;;  %v332_v38 = vld [vmem:[#allocation2] sm:$0xff]  ;;  %v289_v52 = vsel %vm287_vm4, 0, %v288_v50  ;;  %v2417_v53 = vld [vmem:[#allocation6 + $0xd4] ss:$8 sps:$4 sm:$0xff]   ;;  %v2419_v54 = vld [vmem:[#allocation6 + $0xd0] ss:$8 sps:$4 sm:$0xff]  }
  0x7a   : > { %v3094_v40 = vsel %vm3084_vm14, %v314_v36, %v321_v37  ;;  %v3101_v41 = vsel %vm331_vm15, %v313_v35, %v332_v38  ;;  %v2416_v51 = vld [vmem:[#allocation6 + $0xc0] ss:$8 sps:$4 sm:$0xff]   ;;  %290 = vst [vmem:[#allocation2 + $0x10] sm:$0x11] %v289_v52  ;;  %v2420_v55 = vld [vmem:[#allocation6 + $0xe4] ss:$8 sps:$4 sm:$0xff]  }
  0x7b   : > { %334 = vst [vmem:[#allocation2] sm:$0xff] %v3101_v41  ;;  %v2065_v43 = vcombine.high %v3101_v41, %v3094_v40  ;;  %v2422_v57 = vld [vmem:[#allocation6 + $0xe0] ss:$8 sps:$4 sm:$0xff]   ;;  %v2423_v59 = vld [vmem:[#allocation6 + $0xf4] ss:$8 sps:$4 sm:$0xff]   ;;  %v3114_v0 = vcombine.low %v3101_v41, %v3094_v40  ;;  %vm390_vm2 = vcmask 1046528  }
  0x7c   : > { %996 = vmatpush1.bf16.msra.mxu0 %v2392_v9  ;;  %v2425_v61 = vld [vmem:[#allocation6 + $0xf0] ss:$8 sps:$4 sm:$0xff]   ;;  %v2428_v63 = vld [vmem:[#allocation6 + $0x104] ss:$8 sps:$4 sm:$0xff]   ;;  %v2426_v1 = vld [vmem:[#allocation6 + $0x100] ss:$8 sps:$4 sm:$0xff]  }
  0x7d   : > { %997 = vmatprep.subr.bf16.mxu0 %v2393_v10  ;;  %1019 = vmatprep.mubr.bf16.mxu0 %v2065_v43  ;;  %v374_v62 = vshll.u32 %v2065_v43, 16  ;;  %v372_v2 = vshrl.u32 %v2065_v43, 16  ;;  %v2431_v4 = vld [vmem:[#allocation6 + $0x114] ss:$8 sps:$4 sm:$0xff]   ;;  %v2429_v7 = vld [vmem:[#allocation6 + $0x110] ss:$8 sps:$4 sm:$0xff]  }
  0x7e   : > { %v2434_v10 = vld [vmem:[#allocation6 + $0x124] ss:$8 sps:$4 sm:$0xff]   ;;  %v2437_v21 = vld [vmem:[#allocation6 + $0x134] ss:$8 sps:$4 sm:$0xff]   ;;  %v2529_v26 = vld [vmem:[#allocation8 + $0x10] ss:$8 sps:$4 sm:$0xff]  }
  0x7f   : > { %v376_v3 = vrot.slane %v374_v62, 1  ;;  %v2524_v18 = vld [vmem:[#allocation8 + $0x4] ss:$8 sps:$4 sm:$0xff]   ;;  %v2435_v27 = vld [vmem:[#allocation6 + $0x130] ss:$8 sps:$4 sm:$0xff]   ;;  %s1944_s9 = scalar_lea.sflag [#allocation5], %s3044_s29 }
  0x80   : > { %998 = vmatpush1.bf16.msra.mxu0 %v2395_v11  ;;  %1802 = vmatprep.subr.bf16.mxu1 %v2524_v18  ;;  %v2530_v28 = vld [vmem:[#allocation8 + $0x24] ss:$8 sps:$4 sm:$0xff]   ;;  %v2438_v33 = vld [vmem:[#allocation6 + $0x140] ss:$8 sps:$4 sm:$0xff]   ;;  %v2533_v34 = vld [vmem:[#allocation8 + $0x34] ss:$8 sps:$4 sm:$0xff]  }
  0x81   : > { %999 = vmatprep.subr.bf16.mxu0 %v2396_v13  ;;  %v336_v58 = vld [vmem:[#allocation2 + $0x10] sm:$0x11]  ;;  %v377_v8 = vor.u32 %v376_v3, %v372_v2  ;;  %v2432_v13 = vld [vmem:[#allocation6 + $0x120] ss:$8 sps:$4 sm:$0xff]   ;;  %v2446_v38 = vld [vmem:[#allocation6 + $0x164] ss:$8 sps:$4 sm:$0xff]  }
  0x82   : > { %v337_v60 = vsel %vm3063_vm6, %v323_v56, %v336_v58  ;;  %v3122_v15 = vld [vmem:[#allocation2] sm:$0xee]  ;;  %v2443_v35 = vld [vmem:[#allocation6 + $0x154] ss:$8 sps:$4 sm:$0xff]   ;;  %v2441_v36 = vld [vmem:[#allocation6 + $0x150] ss:$8 sps:$4 sm:$0xff]  }
  0x83   : > { %338 = vst [vmem:[#allocation2 + $0x10] sm:$0x11] %v337_v60  ;;  %v2068_v16 = vcombine.low %v3122_v15, %v3094_v40  ;;  %v2535_v37 = vld [vmem:[#allocation8 + $0x30] ss:$8 sps:$4 sm:$0xff]   ;;  %v2444_v43 = vld [vmem:[#allocation6 + $0x160] ss:$8 sps:$4 sm:$0xff]  }
  0x84   : > { %1000 = vmatpush1.bf16.msra.mxu0 %v2398_v20  ;;  %v2526_v20 = vld [vmem:[#allocation8] ss:$8 sps:$4 sm:$0xff]   ;;  %v2545_v52 = vld [vmem:[#allocation8 + $0x74] ss:$8 sps:$4 sm:$0xff]   ;;  %v2548_v56 = vld [vmem:[#allocation8 + $0x84] ss:$8 sps:$4 sm:$0xff]  }
  0x85   : > { %1001 = vmatprep.subr.bf16.mxu0 %v2399_v23  ;;  %v391_v22 = vrot.slane %v2068_v16, 1  ;;  %v2527_v23 = vld [vmem:[#allocation8 + $0x14] ss:$8 sps:$4 sm:$0xff]   ;;  %1803 = vmatpush1.bf16.msra.mxu1 %v2526_v20  ;;  %v2544_v50 = vld [vmem:[#allocation8 + $0x60] ss:$8 sps:$4 sm:$0xff]   ;;  %v362_v3 = vshll.u32 %v3114_v0, 16 }
  0x86   : > { %1804 = vmatprep.subr.bf16.mxu1 %v2527_v23  ;;  %v2550_v58 = vld [vmem:[#allocation8 + $0x80] ss:$8 sps:$4 sm:$0xff]   ;;  %v2551_v60 = vld [vmem:[#allocation8 + $0x94] ss:$8 sps:$4 sm:$0xff]   ;;  %v2459_v62 = vld [vmem:[#allocation6 + $0x1b0] ss:$8 sps:$4 sm:$0xff]  }
  0x87   : > { %v2467_v2 = vld [vmem:[#allocation6 + $0x1d4] ss:$8 sps:$4 sm:$0xff]   ;;  %v2471_v16 = vld [vmem:[#allocation6 + $0x1f0] ss:$8 sps:$4 sm:$0xff]   ;;  %v2581_v32 = vld [vmem:[#allocation8 + $0x124] ss:$8 sps:$4 sm:$0xff]  }
  0x88   : > { %1002 = vmatpush1.bf16.msra.mxu0 %v2401_v30  ;;  %v2440_v30 = vld [vmem:[#allocation6 + $0x144] ss:$8 sps:$4 sm:$0xff]   ;;  %v2577_v24 = vld [vmem:[#allocation8 + $0x114] ss:$8 sps:$4 sm:$0xff]   ;;  %s2760_s12 = scalar_lea.vmem %s3202_s28, 512  ;;  %p3281_p0 = scmp.ne.s32.totalorder %s3268_s23, 0 }
  0x89   : > { %1003 = vmatprep.subr.bf16.mxu0 %v2402_v31  ;;  %1805 = vmatpush1.bf16.msra.mxu1 %v2529_v26  ;;  %v2532_v31 = vld [vmem:[#allocation8 + $0x20] ss:$8 sps:$4 sm:$0xff]   ;;  %p2761_p11 = scmp.ne.s32.totalorder %s3202_s28, %s2760_s12  ;;  %s2839_s13 = smov [#allocation9]  }
  0x8a   : > { %v341_v5 = vld [vmem:[#allocation2 + $0x10] sm:$0x11]  ;;  %1806 = vmatprep.subr.bf16.mxu1 %v2530_v28  ;;  %v2482_v26 = vld [vmem:[#allocation6 + $0x220] ss:$8 sps:$4 sm:$0xff]   ;;  %v2490_v28 = vld [vmem:[#allocation6 + $0x244] ss:$8 sps:$4 sm:$0xff]  }
  0x8b   : > { %v3116_v6 = vcombine.high %v341_v5, %v341_v5  ;;  %v3120_v11 = vcombine.low %v341_v5, %v341_v5  ;;  %v2470_v5 = vld [vmem:[#allocation6 + $0x1e4] ss:$8 sps:$4 sm:$0xff]   ;;  %p2762_p1 = pnand %p2761_p11, %p3281_p0  ;;  %s2764_s17 = sshll.u32 %s2839_s13, 4  ;;  %s2765_s17 = int_to_ptr.vmem [resolvable:$false] %s2764_s17 }
  0x8c   : > { %1004 = vmatpush1.bf16.msra.mxu0 %v2404_v39  ;;  %v2536_v39 = vld [vmem:[#allocation8 + $0x44] ss:$8 sps:$4 sm:$0xff]   ;;  %s2766_s7 = scalar_lea.vmem %s2765_s17, 1024  ;;  %p2767_p7 = scmp.lt.s32.totalorder %s3202_s28, %s2765_s17 }
  0x8d   : > { %1005 = vmatprep.subr.bf16.mxu0 %v2405_v42  ;;  %v379_v9 = vshll.u32 %v3116_v6, 16  ;;  %v392_v17 = vrot.slane %v3120_v11, 1  ;;  %1807 = vmatpush1.bf16.msra.mxu1 %v2532_v31  ;;  %v2538_v42 = vld [vmem:[#allocation8 + $0x40] ss:$8 sps:$4 sm:$0xff]   ;;  %v2493_v31 = vld [vmem:[#allocation6 + $0x254] ss:$8 sps:$4 sm:$0xff]   ;;  %p2763_p3 = pneg %p2762_p1  ;;  %p2768_p9 = scmp.lt.s32.totalorder %s2766_s7, %s2760_s12 }
  0x8e   : > { %1808 = vmatprep.subr.bf16.mxu1 %v2533_v34  ;;  %v2496_v34 = vld [vmem:[#allocation6 + $0x264] ss:$8 sps:$4 sm:$0xff]  }
  0x8f   : > { %v381_v14 = vrot.slane %v379_v9, 1  ;;  %v3129_v25 = vsel %vm390_vm2, %v391_v22, %v392_v17  ;;  %v2468_v9 = vld [vmem:[#allocation6 + $0x1e0] ss:$8 sps:$4 sm:$0xff]   ;;  %p2769_p12 = por %p2768_p9, %p2767_p7 }
  0x90   : > { %1006 = vmatpush1.bf16.msra.mxu0 %v2407_v44  ;;  %v2539_v44 = vld [vmem:[#allocation8 + $0x54] ss:$8 sps:$4 sm:$0xff]  }
  0x91   : > { %1007 = vmatprep.subr.bf16.mxu0 %v2408_v45  ;;  %v382_v19 = vsel %vm358_vm0, %v377_v8, %v381_v14  ;;  %v2449_v45 = vld [vmem:[#allocation6 + $0x174] ss:$8 sps:$4 sm:$0xff]   ;;  %1809 = vmatpush1.bf16.msra.mxu1 %v2535_v37  ;;  %v364_v8 = vrot.slane %v362_v3, 1  ;;  %v2069_v14 = vcombine.high %v3122_v15, %v3094_v40  ;;  %v2479_v40 = vld [vmem:[#allocation6 + $0x210] ss:$8 sps:$4 sm:$0xff]   ;;  %p2770_p2 = pnand %p2769_p12, %p2763_p3 }
  0x92   : > { %1810 = vmatprep.subr.bf16.mxu1 %v2536_v39  ;;  %v2484_v15 = vld [vmem:[#allocation6 + $0x224] ss:$8 sps:$4 sm:$0xff]   ;;  %v2497_v37 = vld [vmem:[#allocation6 + $0x270] ss:$8 sps:$4 sm:$0xff]   ;;  %v2500_v39 = vld [vmem:[#allocation6 + $0x280] ss:$8 sps:$4 sm:$0xff]  }
  0x93   : > { %v394_v20 = vrot.slane %v2069_v14, 1  ;;  %v2569_v3 = vld [vmem:[#allocation8 + $0xf4] ss:$8 sps:$4 sm:$0xff]  }
  0x94   : > { %1008 = vmatpush1.bf16.msra.mxu0 %v2410_v46  ;;  %v2541_v46 = vld [vmem:[#allocation8 + $0x50] ss:$8 sps:$4 sm:$0xff]  }
  0x95   : > { %1009 = vmatprep.subr.bf16.mxu0 %v2411_v47  ;;  %v2447_v47 = vld [vmem:[#allocation6 + $0x170] ss:$8 sps:$4 sm:$0xff]   ;;  %1811 = vmatpush1.bf16.msra.mxu1 %v2538_v42  ;;  %v2505_v42 = vld [vmem:[#allocation6 + $0x294] ss:$8 sps:$4 sm:$0xff]  }
  0x96   : > { %1812 = vmatprep.subr.bf16.mxu1 %v2539_v44  ;;  %v2508_v44 = vld [vmem:[#allocation6 + $0x2a4] ss:$8 sps:$4 sm:$0xff]  }
  0x98   : > { %1010 = vmatpush1.bf16.msra.mxu0 %v2413_v48  ;;  %v2542_v48 = vld [vmem:[#allocation8 + $0x64] ss:$8 sps:$4 sm:$0xff]  }
  0x99   : > { %1011 = vmatprep.subr.bf16.mxu0 %v2414_v49  ;;  %v2452_v49 = vld [vmem:[#allocation6 + $0x184] ss:$8 sps:$4 sm:$0xff]   ;;  %1813 = vmatpush1.bf16.msra.mxu1 %v2541_v46  ;;  %v2511_v46 = vld [vmem:[#allocation6 + $0x2b4] ss:$8 sps:$4 sm:$0xff]  }
  0x9a   : > { %1814 = vmatprep.subr.bf16.mxu1 %v2542_v48  ;;  %v2514_v48 = vld [vmem:[#allocation6 + $0x2c4] ss:$8 sps:$4 sm:$0xff]  }
  0x9c   : > { %1012 = vmatpush1.bf16.msra.mxu0 %v2416_v51  ;;  %v2450_v51 = vld [vmem:[#allocation6 + $0x180] ss:$8 sps:$4 sm:$0xff]  }
  0x9d   : > { %1013 = vmatprep.subr.bf16.mxu0 %v2417_v53  ;;  %v2455_v53 = vld [vmem:[#allocation6 + $0x194] ss:$8 sps:$4 sm:$0xff]   ;;  %1815 = vmatpush1.bf16.msra.mxu1 %v2544_v50 }
  0x9e   : > { %1816 = vmatprep.subr.bf16.mxu1 %v2545_v52  ;;  %v2517_v50 = vld [vmem:[#allocation6 + $0x2d4] ss:$8 sps:$4 sm:$0xff]   ;;  %v2520_v52 = vld [vmem:[#allocation6 + $0x2e4] ss:$8 sps:$4 sm:$0xff]  }
  0xa0   : > { %1014 = vmatpush1.bf16.msra.mxu0 %v2419_v54  ;;  %v2547_v54 = vld [vmem:[#allocation8 + $0x70] ss:$8 sps:$4 sm:$0xff]  }
  0xa1   : > { %1015 = vmatprep.subr.bf16.mxu0 %v2420_v55  ;;  %v2453_v55 = vld [vmem:[#allocation6 + $0x190] ss:$8 sps:$4 sm:$0xff]   ;;  %1817 = vmatpush1.bf16.msra.mxu1 %v2547_v54  ;;  %v2523_v54 = vld [vmem:[#allocation6 + $0x2f4] ss:$8 sps:$4 sm:$0xff]  }
  0xa2   : > { %1818 = vmatprep.subr.bf16.mxu1 %v2548_v56  ;;  %v2553_v56 = vld [vmem:[#allocation8 + $0x90] ss:$8 sps:$4 sm:$0xff]  }
  0xa4   : > { %1016 = vmatpush1.bf16.msra.mxu0 %v2422_v57  ;;  %v2458_v57 = vld [vmem:[#allocation6 + $0x1a4] ss:$8 sps:$4 sm:$0xff]  }
  0xa5   : > { %1017 = vmatprep.subr.bf16.mxu0 %v2423_v59  ;;  %v2456_v59 = vld [vmem:[#allocation6 + $0x1a0] ss:$8 sps:$4 sm:$0xff]   ;;  %1819 = vmatpush1.bf16.msra.mxu1 %v2550_v58 }
  0xa6   : > { %1820 = vmatprep.subr.bf16.mxu1 %v2551_v60  ;;  %v2556_v58 = vld [vmem:[#allocation8 + $0xa0] ss:$8 sps:$4 sm:$0xff]   ;;  %v2559_v60 = vld [vmem:[#allocation8 + $0xb0] ss:$8 sps:$4 sm:$0xff]  }
  0xa8   : > { %1018 = vmatpush1.bf16.msra.mxu0 %v2425_v61  ;;  %v2461_v61 = vld [vmem:[#allocation6 + $0x1b4] ss:$8 sps:$4 sm:$0xff]  }
  0xa9   : > { %1030 = vmatprep.subr.bf16.mxu0 %v2428_v63  ;;  %v2464_v63 = vld [vmem:[#allocation6 + $0x1c4] ss:$8 sps:$4 sm:$0xff]   ;;  %1821 = vmatpush1.bf16.msra.mxu1 %v2553_v56 }
  0xab   : > { %1020 = vmatmul.mubr.bf16.vlgmr.msra.gmra.mrb[0].mxu0 %v3114_v0 }
  0xac   : > { %1031 = vmatpush1.bf16.msra.mxu0 %v2426_v1  ;;  %1062 = vmatprep.mubr.bf16.mxu0 %v382_v19  ;;  %v2462_v1 = vld [vmem:[#allocation6 + $0x1c0] ss:$8 sps:$4 sm:$0xff]   ;;  %v2477_v19 = vld [vmem:[#allocation6 + $0x204] ss:$8 sps:$4 sm:$0xff]  }
  0xad   : > { %1032 = vmatprep.subr.bf16.mxu0 %v2431_v4  ;;  %v2465_v4 = vld [vmem:[#allocation6 + $0x1d0] ss:$8 sps:$4 sm:$0xff]  }
  0xb0   : > { %1033 = vmatpush1.bf16.msra.mxu0 %v2429_v7  ;;  %v360_v7 = vshrl.u32 %v3114_v0, 16  ;;  %v2475_v0 = vld [vmem:[#allocation6 + $0x200] ss:$8 sps:$4 sm:$0xff]  }
  0xb1   : > { %1034 = vmatprep.subr.bf16.mxu0 %v2434_v10  ;;  %v367_v10 = vshll.u32 %v3120_v11, 16  ;;  %v2481_v11 = vld [vmem:[#allocation6 + $0x214] ss:$8 sps:$4 sm:$0xff]  }
  0xb2   : > { %v365_v17 = vor.u32 %v364_v8, %v360_v7  ;;  %v497_v7 = vlaneseq }
  0xb3   : > { %v369_v18 = vrot.slane %v367_v10, 1  ;;  %v495_v10 = vld [vmem:[%s3256_s2] sm:$0x3] }
  0xb4   : > { %1035 = vmatpush1.bf16.msra.mxu0 %v2432_v13  ;;  %v2473_v13 = vld [vmem:[#allocation6 + $0x1f4] ss:$8 sps:$4 sm:$0xff]   ;;  %v3140_v8 = vshrl.u32 %v497_v7, 7  ;;  %v2591_v7 = vld [vmem:[#allocation8 + $0x160] ss:$8 sps:$4 sm:$0xff]  }
  0xb5   : > { %1036 = vmatprep.subr.bf16.mxu0 %v2437_v21  ;;  %v395_v21 = vrot.slane %v3116_v6, 1  ;;  %v370_v22 = vsel %vm358_vm0, %v365_v17, %v369_v18  ;;  %v2485_v6 = vld [vmem:[#allocation6 + $0x230] ss:$8 sps:$4 sm:$0xff]  }
  0xb7   : > { %v396_v23 = vsel %vm390_vm2, %v394_v20, %v395_v21 }
  0xb8   : > { %1037 = vmatpush1.bf16.msra.mxu0 %v2435_v27  ;;  %v2487_v27 = vld [vmem:[#allocation6 + $0x234] ss:$8 sps:$4 sm:$0xff]  }
  0xb9   : > { %1038 = vmatprep.subr.bf16.mxu0 %v2440_v30  ;;  %v2488_v30 = vld [vmem:[#allocation6 + $0x240] ss:$8 sps:$4 sm:$0xff]  }
  0xbc   : > { %1039 = vmatpush1.bf16.msra.mxu0 %v2438_v33  ;;  %v2491_v33 = vld [vmem:[#allocation6 + $0x250] ss:$8 sps:$4 sm:$0xff]  }
  0xbd   : > { %1040 = vmatprep.subr.bf16.mxu0 %v2443_v35  ;;  %v2494_v35 = vld [vmem:[#allocation6 + $0x260] ss:$8 sps:$4 sm:$0xff]  }
  0xc0   : > { %1041 = vmatpush1.bf16.msra.mxu0 %v2441_v36  ;;  %v2499_v36 = vld [vmem:[#allocation6 + $0x274] ss:$8 sps:$4 sm:$0xff]  }
  0xc1   : > { %1042 = vmatprep.subr.bf16.mxu0 %v2446_v38  ;;  %v2502_v38 = vld [vmem:[#allocation6 + $0x284] ss:$8 sps:$4 sm:$0xff]  }
  0xc4   : > { %1043 = vmatpush1.bf16.msra.mxu0 %v2444_v43  ;;  %v2503_v43 = vld [vmem:[#allocation6 + $0x290] ss:$8 sps:$4 sm:$0xff]  }
  0xc5   : > { %1044 = vmatprep.subr.bf16.mxu0 %v2449_v45  ;;  %v2506_v45 = vld [vmem:[#allocation6 + $0x2a0] ss:$8 sps:$4 sm:$0xff]  }
  0xc8   : > { %1045 = vmatpush1.bf16.msra.mxu0 %v2447_v47  ;;  %v2509_v47 = vld [vmem:[#allocation6 + $0x2b0] ss:$8 sps:$4 sm:$0xff]  }
  0xc9   : > { %1046 = vmatprep.subr.bf16.mxu0 %v2452_v49  ;;  %v2512_v49 = vld [vmem:[#allocation6 + $0x2c0] ss:$8 sps:$4 sm:$0xff]  }
  0xcc   : > { %1047 = vmatpush1.bf16.msra.mxu0 %v2450_v51  ;;  %v2515_v51 = vld [vmem:[#allocation6 + $0x2d0] ss:$8 sps:$4 sm:$0xff]  }
  0xcd   : > { %1048 = vmatprep.subr.bf16.mxu0 %v2455_v53  ;;  %v2518_v53 = vld [vmem:[#allocation6 + $0x2e0] ss:$8 sps:$4 sm:$0xff]  }
  0xd0   : > { %1049 = vmatpush1.bf16.msra.mxu0 %v2453_v55  ;;  %v2521_v55 = vld [vmem:[#allocation6 + $0x2f0] ss:$8 sps:$4 sm:$0xff]  }
  0xd1   : > { %1050 = vmatprep.subr.bf16.mxu0 %v2458_v57  ;;  %v2554_v57 = vld [vmem:[#allocation8 + $0xa4] ss:$8 sps:$4 sm:$0xff]  }
  0xd2   : > { %1822 = vmatprep.subr.bf16.mxu1 %v2554_v57 }
  0xd3   : > { %1823 = vmatpush1.bf16.msra.mxu1 %v2556_v58 }
  0xd4   : > { %1051 = vmatpush1.bf16.msra.mxu0 %v2456_v59  ;;  %v2557_v59 = vld [vmem:[#allocation8 + $0xb4] ss:$8 sps:$4 sm:$0xff]  }
  0xd5   : > { %1052 = vmatprep.subr.bf16.mxu0 %v2461_v61  ;;  %1824 = vmatprep.subr.bf16.mxu1 %v2557_v59  ;;  %v2560_v61 = vld [vmem:[#allocation8 + $0xc4] ss:$8 sps:$4 sm:$0xff]  }
  0xd7   : > { %1825 = vmatpush1.bf16.msra.mxu1 %v2559_v60 }
  0xd8   : > { %1053 = vmatpush1.bf16.msra.mxu0 %v2459_v62  ;;  %v2562_v62 = vld [vmem:[#allocation8 + $0xc0] ss:$8 sps:$4 sm:$0xff]   ;;  %1826 = vmatprep.subr.bf16.mxu1 %v2560_v61 }
  0xd9   : > { %1054 = vmatprep.subr.bf16.mxu0 %v2464_v63  ;;  %v2563_v63 = vld [vmem:[#allocation8 + $0xd4] ss:$8 sps:$4 sm:$0xff]  }
  0xdb   : > { %1827 = vmatpush1.bf16.msra.mxu1 %v2562_v62  ;;  %v2582_v62 = vld [vmem:[#allocation8 + $0x130] ss:$8 sps:$4 sm:$0xff]  }
  0xdc   : > { %1055 = vmatpush1.bf16.msra.mxu0 %v2462_v1  ;;  %v2565_v1 = vld [vmem:[#allocation8 + $0xd0] ss:$8 sps:$4 sm:$0xff]   ;;  %1828 = vmatprep.subr.bf16.mxu1 %v2563_v63 }
  0xdd   : > { %1056 = vmatprep.subr.bf16.mxu0 %v2467_v2  ;;  %v2566_v2 = vld [vmem:[#allocation8 + $0xe4] ss:$8 sps:$4 sm:$0xff]  }
  0xdf   : > { %1829 = vmatpush1.bf16.msra.mxu1 %v2565_v1  ;;  %v2587_v1 = vld [vmem:[#allocation8 + $0x144] ss:$8 sps:$4 sm:$0xff]  }
  0xe0   : > { %1057 = vmatpush1.bf16.msra.mxu0 %v2465_v4  ;;  %1830 = vmatprep.subr.bf16.mxu1 %v2566_v2  ;;  %v2571_v4 = vld [vmem:[#allocation8 + $0xf0] ss:$8 sps:$4 sm:$0xff]  }
  0xe1   : > { %1058 = vmatprep.subr.bf16.mxu0 %v2470_v5  ;;  %v2574_v5 = vld [vmem:[#allocation8 + $0x104] ss:$8 sps:$4 sm:$0xff]  }
  0xe4   : > { %1059 = vmatpush1.bf16.msra.mxu0 %v2468_v9  ;;  %v499_v9 = vsub.s32 0, %v3140_v8 }
  0xe5   : > { %1060 = vmatprep.subr.bf16.mxu0 %v2473_v13  ;;  %v503_v13 = vsub.s32 1, %v3140_v8 }
  0xe6   : > { %v500_v14 = vrot.slane %v495_v10, %v499_v9 }
  0xe8   : > { %1061 = vmatpush1.bf16.msra.mxu0 %v2471_v16  ;;  %v504_v16 = vrot.slane %v495_v10, %v503_v13  ;;  %v2596_v10 = vld [vmem:[#allocation8 + $0x174] ss:$8 sps:$4 sm:$0xff]  }
  0xe9   : > { %1073 = vmatprep.subr.bf16.mxu0 %v2477_v19 }
  0xeb   : > { %1063 = vmatmul.mubr.bf16.vlgmr.msra.gmra.mrb[0].mxu0 %v370_v22 }
  0xec   : > { %1074 = vmatpush1.bf16.msra.mxu0 %v2475_v0  ;;  %1105 = vmatprep.mubr.bf16.mxu0 %v396_v23 }
  0xed   : > { %1075 = vmatprep.subr.bf16.mxu0 %v2481_v11 }
  0xf0   : > { %1076 = vmatpush1.bf16.msra.mxu0 %v2479_v40 }
  0xf1   : > { %1077 = vmatprep.subr.bf16.mxu0 %v2484_v15 }
  0xf4   : > { %1078 = vmatpush1.bf16.msra.mxu0 %v2482_v26 }
  0xf5   : > { %1079 = vmatprep.subr.bf16.mxu0 %v2487_v27 }
  0xf8   : > { %1080 = vmatpush1.bf16.msra.mxu0 %v2485_v6 }
  0xf9   : > { %1081 = vmatprep.subr.bf16.mxu0 %v2490_v28 }
  0xfc   : > { %1082 = vmatpush1.bf16.msra.mxu0 %v2488_v30 }
  0xfd   : > { %1083 = vmatprep.subr.bf16.mxu0 %v2493_v31 }
 0x100   : > { %1084 = vmatpush1.bf16.msra.mxu0 %v2491_v33 }
 0x101   : > { %1085 = vmatprep.subr.bf16.mxu0 %v2496_v34 }
 0x104   : > { %1086 = vmatpush1.bf16.msra.mxu0 %v2494_v35 }
 0x105   : > { %1087 = vmatprep.subr.bf16.mxu0 %v2499_v36 }
 0x108   : > { %1088 = vmatpush1.bf16.msra.mxu0 %v2497_v37  ;;  %v1153_v37 = vld [vmem:[#allocation2 + $0x10] sm:$0x11] }
 0x109   : > { %1089 = vmatprep.subr.bf16.mxu0 %v2502_v38 }
 0x10c   : > { %1090 = vmatpush1.bf16.msra.mxu0 %v2500_v39 }
 0x10d   : > { %1091 = vmatprep.subr.bf16.mxu0 %v2505_v42 }
 0x110   : > { %1092 = vmatpush1.bf16.msra.mxu0 %v2503_v43 }
 0x111   : > { %1093 = vmatprep.subr.bf16.mxu0 %v2508_v44 }
 0x114   : > { %1094 = vmatpush1.bf16.msra.mxu0 %v2506_v45 }
 0x115   : > { %1095 = vmatprep.subr.bf16.mxu0 %v2511_v46 }
 0x118   : > { %1096 = vmatpush1.bf16.msra.mxu0 %v2509_v47  ;;  %v2572_v47 = vld [vmem:[#allocation8 + $0x100] ss:$8 sps:$4 sm:$0xff]  }
 0x119   : > { %1097 = vmatprep.subr.bf16.mxu0 %v2514_v48  ;;  %v2575_v48 = vld [vmem:[#allocation8 + $0x110] ss:$8 sps:$4 sm:$0xff]  }
 0x11c   : > { %1098 = vmatpush1.bf16.msra.mxu0 %v2512_v49 }
 0x11d   : > { %1099 = vmatprep.subr.bf16.mxu0 %v2517_v50 }
 0x120   : > { %1100 = vmatpush1.bf16.msra.mxu0 %v2515_v51 }
 0x121   : > { %1101 = vmatprep.subr.bf16.mxu0 %v2520_v52 }
 0x124   : > { %1102 = vmatpush1.bf16.msra.mxu0 %v2518_v53  ;;  %v2579_v53 = vld [vmem:[#allocation8 + $0x120] ss:$8 sps:$4 sm:$0xff]  }
 0x125   : > { %1103 = vmatprep.subr.bf16.mxu0 %v2523_v54 }
 0x128   : > { %1104 = vmatpush1.bf16.msra.mxu0 %v2521_v55  ;;  %v2584_v55 = vld [vmem:[#allocation8 + $0x134] ss:$8 sps:$4 sm:$0xff]  }
 0x12b   : > { %1106 = vmatmul.mubr.bf16.vlgmr.msra.gmra.mrb[0].mxu0 %v3129_v25  ;;  %v2568_v25 = vld [vmem:[#allocation8 + $0xe0] ss:$8 sps:$4 sm:$0xff]  }
 0x12c   : > { %1831 = vmatpush1.bf16.msra.mxu1 %v2568_v25  ;;  %v2585_v25 = vld [vmem:[#allocation8 + $0x140] ss:$8 sps:$4 sm:$0xff]  }
 0x12d   : > { %1832 = vmatprep.subr.bf16.mxu1 %v2569_v3  ;;  %v2590_v3 = vld [vmem:[#allocation8 + $0x154] ss:$8 sps:$4 sm:$0xff]  }
 0x130   : > { %1833 = vmatpush1.bf16.msra.mxu1 %v2571_v4  ;;  %v2588_v4 = vld [vmem:[#allocation8 + $0x150] ss:$8 sps:$4 sm:$0xff]  }
 0x131   : > { %1845 = vmatprep.subr.bf16.mxu1 %v2574_v5  ;;  %v2593_v5 = vld [vmem:[#allocation8 + $0x164] ss:$8 sps:$4 sm:$0xff]  }
 0x1fe   : > { %v1107_v17 = vpop.f32.mrb[0].mxu0 }
 0x1ff   : > { %v2281_v18 = vadd.f32 %v1107_v17, %v500_v14  ;;  %v1109_v19 = vpop.f32.mrb[1].mxu0  ;;  %v2597_v17 = vld [vmem:[#allocation8 + $0x180] ss:$8 sps:$4 sm:$0xff]  }
 0x200   : > { %v2282_v20 = vadd.f32 %v1109_v19, %v504_v16  ;;  %v1111_v21 = vpop.f32.mrb[2].mxu0  ;;  %v2600_v19 = vld [vmem:[#allocation8 + $0x190] ss:$8 sps:$4 sm:$0xff]  }
 0x201   : > { %v1116_v0 = vmax.f32 %v2281_v18, 0.0  ;;  %v2283_v22 = vadd.f32 %v1111_v21, %v500_v14  ;;  %v1113_v11 = vpop.f32.mrb[3].mxu0  ;;  %v2594_v14 = vld [vmem:[#allocation8 + $0x170] ss:$8 sps:$4 sm:$0xff]   ;;  %v2602_v18 = vld [vmem:[#allocation8 + $0x194] ss:$8 sps:$4 sm:$0xff]  }
 0x202   : > { %v1117_v23 = vmax.f32 %v2282_v20, 0.0  ;;  %v2284_v40 = vadd.f32 %v1113_v11, %v504_v16  ;;  %v2599_v16 = vld [vmem:[#allocation8 + $0x184] ss:$8 sps:$4 sm:$0xff]   ;;  %v2603_v21 = vld [vmem:[#allocation8 + $0x1a0] ss:$8 sps:$4 sm:$0xff]  }
 0x203   : > { %v1118_v15 = vmax.f32 %v2283_v22, 0.0  ;;  %v2605_v20 = vld [vmem:[#allocation8 + $0x1a4] ss:$8 sps:$4 sm:$0xff]   ;;  %v2606_v22 = vld [vmem:[#allocation8 + $0x1b0] ss:$8 sps:$4 sm:$0xff]  }
 0x204   : > { %v2278_v26 = vpack.c.bf16 %v1117_v23, %v1116_v0  ;;  %v1119_v27 = vmax.f32 %v2284_v40, 0.0  ;;  %v2608_v0 = vld [vmem:[#allocation8 + $0x1b4] ss:$8 sps:$4 sm:$0xff]   ;;  %v2611_v11 = vld [vmem:[#allocation8 + $0x1c4] ss:$8 sps:$4 sm:$0xff]  }
 0x205   : > { %v2609_v23 = vld [vmem:[#allocation8 + $0x1c0] ss:$8 sps:$4 sm:$0xff]   ;;  %v2614_v40 = vld [vmem:[#allocation8 + $0x1d4] ss:$8 sps:$4 sm:$0xff]  }
 0x206   : > { %v1131_v6 = vshrl.u32 %v2278_v26, 16  ;;  %v2279_v28 = vpack.c.bf16 %v1119_v27, %v1118_v15  ;;  %v1134_v31 = vshll.u32 %v2278_v26, 16  ;;  %v2612_v15 = vld [vmem:[#allocation8 + $0x1d0] ss:$8 sps:$4 sm:$0xff]   ;;  %v2617_v26 = vld [vmem:[#allocation8 + $0x1e4] ss:$8 sps:$4 sm:$0xff]  }
 0x208   : > { %v1133_v30 = vrot.slane %v1131_v6, 7  ;;  %v1139_v33 = vshrl.u32 %v2279_v28, 16  ;;  %v1142_v36 = vshll.u32 %v2279_v28, 16  ;;  %v2615_v6 = vld [vmem:[#allocation8 + $0x1e0] ss:$8 sps:$4 sm:$0xff]  }
 0x209   : > { %v2620_v28 = vld [vmem:[#allocation8 + $0x1f4] ss:$8 sps:$4 sm:$0xff]  }
 0x20a   : > { %v1136_v34 = vor.u32 %v1134_v31, %v1133_v30  ;;  %v1141_v35 = vrot.slane %v1139_v33, 7  ;;  %v1137_v38 = vrot.slane %v1133_v30, 4  ;;  %v2618_v33 = vld [vmem:[#allocation8 + $0x1f0] ss:$8 sps:$4 sm:$0xff]  }
 0x20c   : > { %v1150_v39 = vsel %vm331_vm15, %v1136_v34, %v3101_v41  ;;  %v1144_v42 = vor.u32 %v1142_v36, %v1141_v35  ;;  %v1146_v43 = vrot.slane %v1141_v35, 4  ;;  %v2624_v34 = vld [vmem:[#allocation8 + $0x204] ss:$8 sps:$4 sm:$0xff]  }
 0x20d   : > { %1151 = vst [vmem:[#allocation2] sm:$0xff] %v1150_v39 }
 0x20e   : > { %v3159_v44 = vsel %vm3084_vm14, %v1137_v38, %v1144_v42  ;;  %v1154_v45 = vsel %vm3063_vm6, %v1146_v43, %v1153_v37  ;;  %v2622_v42 = vld [vmem:[#allocation8 + $0x200] ss:$8 sps:$4 sm:$0xff]  }
 0x20f   : > { %1155 = vst [vmem:[#allocation2 + $0x10] sm:$0x11] %v1154_v45  ;;  %v2169_v46 = vcombine.high %v1150_v39, %v3159_v44  ;;  %v3165_v29 = vcombine.low %v1150_v39, %v3159_v44  ;;  %v2627_v45 = vld [vmem:[#allocation8 + $0x214] ss:$8 sps:$4 sm:$0xff]  }
 0x211   : > { %1834 = vmatprep.mubr.bf16.mxu1 %v2169_v46  ;;  %v1190_v41 = vshll.u32 %v2169_v46, 16  ;;  %v1188_v56 = vshrl.u32 %v2169_v46, 16  ;;  %v1178_v27 = vshll.u32 %v3165_v29, 16  ;;  %v1176_v36 = vshrl.u32 %v3165_v29, 16 }
 0x212   : > { %1835 = vmatmul.mubr.bf16.vlgmr.msra.gmra.mrb[0].mxu1 %v3165_v29  ;;  %v2628_v29 = vld [vmem:[#allocation8 + $0x220] ss:$8 sps:$4 sm:$0xff]  }
 0x213   : > { %1846 = vmatpush1.bf16.msra.mxu1 %v2572_v47  ;;  %v1192_v52 = vrot.slane %v1190_v41, 1  ;;  %v1180_v31 = vrot.slane %v1178_v27, 1  ;;  %v2633_v41 = vld [vmem:[#allocation8 + $0x234] ss:$8 sps:$4 sm:$0xff]  }
 0x214   : > { %1847 = vmatprep.subr.bf16.mxu1 %v2577_v24  ;;  %v3168_v49 = vld [vmem:[#allocation2] sm:$0xee]  ;;  %v2625_v24 = vld [vmem:[#allocation8 + $0x210] ss:$8 sps:$4 sm:$0xff]  }
 0x215   : > { %v2172_v12 = vcombine.low %v3168_v49, %v3159_v44  ;;  %v1193_v60 = vor.u32 %v1192_v52, %v1188_v56  ;;  %v2173_v35 = vcombine.high %v3168_v49, %v3159_v44  ;;  %v1181_v39 = vor.u32 %v1180_v31, %v1176_v36  ;;  %v2630_v44 = vld [vmem:[#allocation8 + $0x224] ss:$8 sps:$4 sm:$0xff]   ;;  %v2634_v49 = vld [vmem:[#allocation8 + $0x240] ss:$8 sps:$4 sm:$0xff]  }
 0x216   : > { %v1158_v50 = vld [vmem:[#allocation2 + $0x10] sm:$0x11]  ;;  %v2640_v52 = vld [vmem:[#allocation8 + $0x260] ss:$8 sps:$4 sm:$0xff]  }
 0x217   : > { %1848 = vmatpush1.bf16.msra.mxu1 %v2575_v48  ;;  %v3172_v51 = vcombine.high %v1158_v50, %v1158_v50  ;;  %v3174_v54 = vcombine.low %v1158_v50, %v1158_v50  ;;  %v1206_v58 = vrot.slane %v2172_v12, 1  ;;  %v1209_v43 = vrot.slane %v2173_v35, 1  ;;  %v2631_v48 = vld [vmem:[#allocation8 + $0x230] ss:$8 sps:$4 sm:$0xff]   ;;  %v2639_v12 = vld [vmem:[#allocation8 + $0x254] ss:$8 sps:$4 sm:$0xff]  }
 0x218   : > { %1849 = vmatprep.subr.bf16.mxu1 %v2581_v32  ;;  %v2636_v32 = vld [vmem:[#allocation8 + $0x244] ss:$8 sps:$4 sm:$0xff]   ;;  %v2637_v50 = vld [vmem:[#allocation8 + $0x250] ss:$8 sps:$4 sm:$0xff]   ;;  %v2646_v56 = vld [vmem:[#allocation8 + $0x280] ss:$8 sps:$4 sm:$0xff]  }
 0x219   : > { %v1195_v57 = vshll.u32 %v3172_v51, 16  ;;  %v1207_v59 = vrot.slane %v3174_v54, 1  ;;  %v1183_v30 = vshll.u32 %v3174_v54, 16  ;;  %v1210_v38 = vrot.slane %v3172_v51, 1  ;;  %v2642_v51 = vld [vmem:[#allocation8 + $0x264] ss:$8 sps:$4 sm:$0xff]  }
 0x21a   : > { %v2643_v54 = vld [vmem:[#allocation8 + $0x270] ss:$8 sps:$4 sm:$0xff]  }
 0x21b   : > { %v1197_v61 = vrot.slane %v1195_v57, 1  ;;  %1850 = vmatpush1.bf16.msra.mxu1 %v2579_v53  ;;  %v3179_v63 = vsel %vm390_vm2, %v1206_v58, %v1207_v59  ;;  %v1185_v37 = vrot.slane %v1183_v30, 1  ;;  %v1211_v47 = vsel %vm390_vm2, %v1209_v43, %v1210_v38  ;;  %v2645_v53 = vld [vmem:[#allocation8 + $0x274] ss:$8 sps:$4 sm:$0xff]   ;;  %v2649_v58 = vld [vmem:[#allocation8 + $0x290] ss:$8 sps:$4 sm:$0xff]  }
 0x21c   : > { %1851 = vmatprep.subr.bf16.mxu1 %v2584_v55  ;;  %v2648_v55 = vld [vmem:[#allocation8 + $0x284] ss:$8 sps:$4 sm:$0xff]   ;;  %v2651_v57 = vld [vmem:[#allocation8 + $0x294] ss:$8 sps:$4 sm:$0xff]  }
 0x21d   : > { %v1198_v2 = vsel %vm358_vm0, %v1193_v60, %v1197_v61  ;;  %v1186_v46 = vsel %vm358_vm0, %v1181_v39, %v1185_v37  ;;  %v2654_v59 = vld [vmem:[#allocation8 + $0x2a4] ss:$8 sps:$4 sm:$0xff]   ;;  %v2652_v60 = vld [vmem:[#allocation8 + $0x2a0] ss:$8 sps:$4 sm:$0xff]   ;;  %v2657_v61 = vld [vmem:[#allocation8 + $0x2b4] ss:$8 sps:$4 sm:$0xff]  }
 0x21e   : > { %1877 = vmatprep.mubr.bf16.mxu1 %v1198_v2  ;;  %v2658_v2 = vld [vmem:[#allocation8 + $0x2c0] ss:$8 sps:$4 sm:$0xff]   ;;  %v2673_v30 = vld [vmem:[%s3050_s6 + $0x18] sm:$0xff] }
 0x21f   : > { %1852 = vmatpush1.bf16.msra.mxu1 %v2582_v62  ;;  %v2655_v62 = vld [vmem:[#allocation8 + $0x2b0] ss:$8 sps:$4 sm:$0xff]  }
 0x220   : > { %1853 = vmatprep.subr.bf16.mxu1 %v2587_v1  ;;  %v2660_v1 = vld [vmem:[#allocation8 + $0x2c4] ss:$8 sps:$4 sm:$0xff]  }
 0x223   : > { %1854 = vmatpush1.bf16.msra.mxu1 %v2585_v25  ;;  %v2663_v25 = vld [vmem:[#allocation8 + $0x2d4] ss:$8 sps:$4 sm:$0xff]  }
 0x224   : > { %1855 = vmatprep.subr.bf16.mxu1 %v2590_v3  ;;  %v2661_v3 = vld [vmem:[#allocation8 + $0x2d0] ss:$8 sps:$4 sm:$0xff]  }
 0x227   : > { %1856 = vmatpush1.bf16.msra.mxu1 %v2588_v4  ;;  %v2666_v4 = vld [vmem:[#allocation8 + $0x2e4] ss:$8 sps:$4 sm:$0xff]  }
 0x228   : > { %1857 = vmatprep.subr.bf16.mxu1 %v2593_v5  ;;  %v2664_v5 = vld [vmem:[#allocation8 + $0x2e0] ss:$8 sps:$4 sm:$0xff]  }
 0x22b   : > { %1858 = vmatpush1.bf16.msra.mxu1 %v2591_v7  ;;  %v2669_v7 = vld [vmem:[#allocation8 + $0x2f4] ss:$8 sps:$4 sm:$0xff]  }
 0x22c   : > { %1859 = vmatprep.subr.bf16.mxu1 %v2596_v10  ;;  %v2667_v10 = vld [vmem:[#allocation8 + $0x2f0] ss:$8 sps:$4 sm:$0xff]  }
 0x22f   : > { %1860 = vmatpush1.bf16.msra.mxu1 %v2594_v14  ;;  %v1310_v14 = vld [vmem:[%s3258_s4] sm:$0x3] }
 0x230   : > { %1861 = vmatprep.subr.bf16.mxu1 %v2599_v16  ;;  %v1315_v16 = vrot.slane %v1310_v14, %v499_v9  ;;  %v2670_v9 = vld [vmem:[%s3050_s6] sm:$0xff] }
 0x233   : > { %1862 = vmatpush1.bf16.msra.mxu1 %v2597_v17  ;;  %v1319_v17 = vrot.slane %v1310_v14, %v503_v13 }
 0x234   : > { %1863 = vmatprep.subr.bf16.mxu1 %v2602_v18 }
 0x237   : > { %1864 = vmatpush1.bf16.msra.mxu1 %v2600_v19 }
 0x238   : > { %1865 = vmatprep.subr.bf16.mxu1 %v2605_v20 }
 0x23b   : > { %1866 = vmatpush1.bf16.msra.mxu1 %v2603_v21 }
 0x23c   : > { %1867 = vmatprep.subr.bf16.mxu1 %v2608_v0 }
 0x23f   : > { %1868 = vmatpush1.bf16.msra.mxu1 %v2606_v22 }
 0x240   : > { %1869 = vmatprep.subr.bf16.mxu1 %v2611_v11 }
 0x243   : > { %1870 = vmatpush1.bf16.msra.mxu1 %v2609_v23 }
 0x244   : > { %1871 = vmatprep.subr.bf16.mxu1 %v2614_v40 }
 0x247   : > { %1872 = vmatpush1.bf16.msra.mxu1 %v2612_v15  ;;  %v2671_v15 = vld [vmem:[%s3050_s6 + $0x8] sm:$0xff] }
 0x248   : > { %1873 = vmatprep.subr.bf16.mxu1 %v2617_v26 }
 0x24b   : > { %1874 = vmatpush1.bf16.msra.mxu1 %v2615_v6  ;;  %v2672_v6 = vld [vmem:[%s3050_s6 + $0x10] sm:$0xff] }
 0x24c   : > { %1875 = vmatprep.subr.bf16.mxu1 %v2620_v28 }
 0x24f   : > { %1876 = vmatpush1.bf16.msra.mxu1 %v2618_v33 }
 0x250   : > { %1888 = vmatprep.subr.bf16.mxu1 %v2624_v34 }
 0x252   : > { %1878 = vmatmul.mubr.bf16.vlgmr.msra.gmra.mrb[0].mxu1 %v1186_v46 }
 0x253   : > { %1889 = vmatpush1.bf16.msra.mxu1 %v2622_v42  ;;  %1920 = vmatprep.mubr.bf16.mxu1 %v1211_v47 }
 0x254   : > { %1890 = vmatprep.subr.bf16.mxu1 %v2627_v45 }
 0x257   : > { %1891 = vmatpush1.bf16.msra.mxu1 %v2625_v24 }
 0x258   : > { %1892 = vmatprep.subr.bf16.mxu1 %v2630_v44 }
 0x25b   : > { %1893 = vmatpush1.bf16.msra.mxu1 %v2628_v29 }
 0x25c   : > { %1894 = vmatprep.subr.bf16.mxu1 %v2633_v41 }
 0x25f   : > { %1895 = vmatpush1.bf16.msra.mxu1 %v2631_v48 }
 0x260   : > { %1896 = vmatprep.subr.bf16.mxu1 %v2636_v32 }
 0x263   : > { %1897 = vmatpush1.bf16.msra.mxu1 %v2634_v49 }
 0x264   : > { %1898 = vmatprep.subr.bf16.mxu1 %v2639_v12 }
 0x267   : > { %1899 = vmatpush1.bf16.msra.mxu1 %v2637_v50 }
 0x268   : > { %1900 = vmatprep.subr.bf16.mxu1 %v2642_v51 }
 0x26b   : > { %1901 = vmatpush1.bf16.msra.mxu1 %v2640_v52 }
 0x26c   : > { %1902 = vmatprep.subr.bf16.mxu1 %v2645_v53 }
 0x26f   : > { %1903 = vmatpush1.bf16.msra.mxu1 %v2643_v54 }
 0x270   : > { %1904 = vmatprep.subr.bf16.mxu1 %v2648_v55 }
 0x273   : > { %1905 = vmatpush1.bf16.msra.mxu1 %v2646_v56 }
 0x274   : > { %1906 = vmatprep.subr.bf16.mxu1 %v2651_v57 }
 0x277   : > { %1907 = vmatpush1.bf16.msra.mxu1 %v2649_v58 }
 0x278   : > { %1908 = vmatprep.subr.bf16.mxu1 %v2654_v59 }
 0x27b   : > { %1909 = vmatpush1.bf16.msra.mxu1 %v2652_v60 }
 0x27c   : > { %1910 = vmatprep.subr.bf16.mxu1 %v2657_v61 }
 0x27f   : > { %1911 = vmatpush1.bf16.msra.mxu1 %v2655_v62 }
 0x280   : > { %1912 = vmatprep.subr.bf16.mxu1 %v2660_v1 }
 0x283   : > { %1913 = vmatpush1.bf16.msra.mxu1 %v2658_v2 }
 0x284   : > { %1914 = vmatprep.subr.bf16.mxu1 %v2663_v25 }
 0x287   : > { %1915 = vmatpush1.bf16.msra.mxu1 %v2661_v3 }
 0x288   : > { %1916 = vmatprep.subr.bf16.mxu1 %v2666_v4 }
 0x28b   : > { %1917 = vmatpush1.bf16.msra.mxu1 %v2664_v5 }
 0x28c   : > { %1918 = vmatprep.subr.bf16.mxu1 %v2669_v7 }
 0x28f   : > { %1919 = vmatpush1.bf16.msra.mxu1 %v2667_v10 }
 0x292   : > { %1921 = vmatmul.mubr.bf16.vlgmr.msra.gmra.mrb[0].mxu1 %v3179_v63 }
 0x365   : > { %v1922_v18 = vpop.f32.mrb[0].mxu1 }
 0x366   : > { %v2285_v19 = vadd.f32 %v1922_v18, %v1315_v16  ;;  %v1924_v20 = vpop.f32.mrb[1].mxu1 }
 0x367   : > { %v2286_v21 = vadd.f32 %v1924_v20, %v1319_v17  ;;  %v1926_v0 = vpop.f32.mrb[2].mxu1 }
 0x368   : > { %v1931_v22 = vmul.f32 0.1, %v2285_v19  ;;  %v2287_v63 = vadd.f32 %v1926_v0, %v1315_v16  ;;  %v1928_v11 = vpop.f32.mrb[3].mxu1 }
 0x369   : > { %v1932_v23 = vmul.f32 0.1, %v2286_v21  ;;  %v2288_v40 = vadd.f32 %v1928_v11, %v1319_v17 }
 0x36a   : > { %v1935_v8 = vadd.f32 %v2670_v9, %v1931_v22  ;;  %v1933_v13 = vmul.f32 0.1, %v2287_v63 }
 0x36b   : > { %v1936_v26 = vadd.f32 %v2671_v15, %v1932_v23  ;;  %v1934_v27 = vmul.f32 0.1, %v2288_v40 }
 0x36c   : > { %1939 = vst [vmem:[%s271_s11] sm:$0xff] %v1935_v8  ;;  %v1937_v28 = vadd.f32 %v2672_v6, %v1933_v13 }
 0x36d   : > { %1940 = vst [vmem:[%s271_s11 + $0x8] sm:$0xff] %v1936_v26  ;;  %v1938_v31 = vadd.f32 %v2673_v30, %v1934_v27 }
 0x36e   : > { %1941 = vst [vmem:[%s271_s11 + $0x10] sm:$0xff] %v1937_v28 }
 0x36f   : > { %1942 = vst [vmem:[%s271_s11 + $0x18] sm:$0xff] %v1938_v31 }
 0x370   : > { %2773 = shalt.err (!%p2770_p2)
}
 0x371   : > { %s2774_s6 = scalar_lea.hbm %s3209_s22, 512  ;;  %s2778_s8 = scalar_lea.hbm %s3259_s5, 1024 }
 0x372   : > { %p2775_p13 = scmp.ne.s32.totalorder %s3209_s22, %s2774_s6  ;;  %p2779_p4 = scmp.lt.u32.totalorder %s3209_s22, %s3259_s5 }
 0x373   : > { %p2780_p5 = scmp.lt.u32.totalorder %s2778_s8, %s2774_s6  ;;  %p2782_p11 = scmp.lt.u32.totalorder %s2774_s6, %s3209_s22 }
 0x374   : > { %p2776_p6 = pnand %p2775_p13, %p3281_p0 }
 0x375   : > { %p2781_p8 = por %p2780_p5, %p2779_p4 }
 0x376   : > { %p2777_p10 = pneg %p2776_p6 }
 0x377   : > { %p2783_p1 = por %p2782_p11, %p2781_p8 }
 0x379   : > { %p2784_p3 = pnand %p2783_p1, %p2777_p10 }
 0x37b   : > { %2787 = shalt.err (!%p2784_p3)
}
 0x37c   : > { %s2840_s30 = smov 256   ;;  %s2841_s15 = smov 16  }
 0x37d   : > { %2315 = dma.vmem_to_hbm [thread:$0]  (%p3281_p0), %s3202_s28, 512, %s3209_s22, %s1944_s9, %s2840_s30, %s2840_s30, %s2841_s15  }
 0x37e PF: > { %s1972_s16 = sand.u32 1, %s2818_s18   ;;  %p3282_p7 = scmp.ne.s32.totalorder %s3264_s25, 0 }
 0x37f   : > { %p3283_p9 = scmp.ge.s32.totalorder %s2830_s21, 2  ;;  %s1973_s12 = scalar_lea.sflag [#allocation5], %s1972_s16 }
 0x381   : > { %p2329_p12 = pnand %p3283_p9, %p3282_p7 }
 0x383   : > { %2813 = dma.done.wait (!%p2329_p12), %s1973_s12, 512  }
 0x384   : > { %2815 = vsyncadd (!%p2329_p12), %s1973_s12, 4294966784  ;;  %p19_p2 = scmp.ge.s32.totalorder %s2982_s14, 4   ;;  %s3284_s18 = smov %s2822_s19 }
 0x385   : > { %s3285_s19 = smov %s2826_s20  ;;  %s3286_s20 = smov %s2998_s27 }
 0x386   : > { %s3287_s21 = smov %s2982_s14  ;;  %21 = sbr.rel (!%p19_p2) target bundleno = 6 (0x6), region = 93 }
 0x38d   :  { %1978 = vsyncpa [#allocation4], 1 }
 0x38e   :  { %1980 = vsyncpa [#allocation4 + $0x1], 1 }
 0x38f   :  { %1981 = vsyncpa [#allocation7], 1 }
 0x390   :  { %1982 = vsyncpa [#allocation5], 1 }
 0x391   :  { %1984 = vsyncpa [#allocation5 + $0x1], 1 }

</bundles_post_ra>
